<compile_context>
chip_gen: v7x
topology: tpu7x:2x2x1
jax: 0.10.0
libtpu: 0.0.40
codegen_flags: <defaults>
</compile_context>

<pallas_src>
import functools

import jax
import jax.numpy as jnp
from jax.experimental import pallas as pl
from jax.experimental.pallas import tpu as pltpu


def _cdiv(a, b):
    return -(-a // b)


def _lm_criterion_kernel(inp_ref, tgt_ref, msk_ref, out_ref, *, n_rows):
    i = pl.program_id(0)   # row-tile index
    v = pl.program_id(1)   # vocab-tile index (reduction axis, last)

    x = inp_ref[...]       # (R, TV) log-prob tile, kept in input dtype
    tgt = tgt_ref[...]     # (R, 1) int32 token ids
    r, tv = x.shape

    # gather(input, 2, target) restricted to this vocab tile:
    # a (1, TV) iota broadcasts against the (R, 1) targets. In the ragged last
    # vocab tile ids >= V never equal a valid target, so OOB garbage is never
    # selected. Note: out-of-range / negative target ids silently gather 0
    # (PyTorch's gather would error) — fine for masked usage.
    ids = jax.lax.broadcasted_iota(jnp.int32, (1, tv), 1) + v * tv
    sel = jnp.where(ids == tgt, x, jnp.zeros((), dtype=x.dtype))
    # Exact in any dtype: at most one non-zero per row. Cast only the (R, 1)
    # result to f32 (no full-tile upcast).
    gathered = jnp.sum(sel, axis=1, keepdims=True).astype(jnp.float32)

    @pl.when(v == 0)
    def _():
        out_ref[...] = jnp.zeros_like(out_ref)

    # Output block index is constant along the vocab axis -> resident VMEM
    # accumulator.
    out_ref[...] += gathered

    @pl.when(v == pl.num_programs(1) - 1)
    def _():
        # Gate tail rows of a ragged final row tile: their x/tgt/msk reads are
        # out-of-bounds garbage, so force their contribution to exactly 0.
        row_ids = jax.lax.broadcasted_iota(jnp.int32, (r, 1), 0) + i * r
        valid = row_ids < n_rows
        out_ref[...] = jnp.where(valid, -out_ref[...] * msk_ref[...], 0.0)


def _generation_defaults():
    """(target_block_bytes, vmem_limit_bytes) per TPU generation."""
    kind = ""
    try:
        kind = jax.devices()[0].device_kind.lower()
    except Exception:
        pass
    if "v7" in kind:
        return 8 << 20, 40 << 20      # 64 MiB physical VMEM: leave headroom
    if "v5" in kind or "v6" in kind:
        return 16 << 20, 64 << 20     # 128 MiB physical VMEM
    return 8 << 20, 40 << 20          # conservative default for unknown chips


def _pick_vocab_tile(V, max_tv=2048):
    """Full vocab if small, else a fixed lane-dense tile (multiple of 128)."""
    if V <= max_tv:
        return V
    return max_tv


def _pick_row_tile(N, tv, itemsize, target_bytes, min_row_tiles=8):
    """Row tile (multiple of 16) giving ~target_bytes input blocks, capped so
    the grid keeps >= min_row_tiles row tiles (2-TC split on v7x)."""
    r = target_bytes // max(1, tv * itemsize)
    r = max(16, (r // 16) * 16)
    per_tile_cap = max(16, _cdiv(_cdiv(N, min_row_tiles), 16) * 16)
    r = min(r, per_tile_cap)
    n_cap = _cdiv(N, 16) * 16             # don't exceed (rounded) problem size
    return max(16, min(r, n_cap))


def language_model_criterion(inp, target, mask, *,
                             target_block_bytes=None,
                             vmem_limit_bytes=None,
                             max_vocab_tile=2048):
    """Equivalent of LanguageModelCriterion.forward(input, target, mask)."""
    B, T, V = inp.shape
    N = B * T

    # glue: truncate target/mask to the input length, flatten rows (cheap —
    # these are (N,) sized, the big (N, V) tensor is only reshaped).
    tgt = target[:, :T].astype(jnp.int32).reshape(N, 1)
    msk = mask[:, :T].astype(jnp.float32).reshape(N, 1)
    x = inp.reshape(N, V)

    tb_default, vl_default = _generation_defaults()
    tb = target_block_bytes if target_block_bytes is not None else tb_default
    vl = vmem_limit_bytes if vmem_limit_bytes is not None else vl_default

    tv = _pick_vocab_tile(V, max_vocab_tile)
    r = _pick_row_tile(N, tv, jnp.dtype(inp.dtype).itemsize, tb)

    num_row_tiles = _cdiv(N, r)
    num_vocab_tiles = _cdiv(V, tv)

    kernel = functools.partial(_lm_criterion_kernel, n_rows=N)

    row_loss = pl.pallas_call(
        kernel,
        out_shape=jax.ShapeDtypeStruct((N, 1), jnp.float32),
        grid_spec=pltpu.PrefetchScalarGridSpec(
            num_scalar_prefetch=0,
            grid=(num_row_tiles, num_vocab_tiles),
            in_specs=[
                pl.BlockSpec((r, tv), lambda i, j: (i, j)),   # contiguous rows
                pl.BlockSpec((r, 1), lambda i, j: (i, 0)),    # targets
                pl.BlockSpec((r, 1), lambda i, j: (i, 0)),    # mask
            ],
            out_specs=pl.BlockSpec((r, 1), lambda i, j: (i, 0)),
        ),
        compiler_params=pltpu.CompilerParams(
            dimension_semantics=("parallel", "arbitrary"),
            vmem_limit_bytes=vl,
        ),
    )(x, tgt, msk)

    # Tiny finalization in the wrapper (sum of N floats + scalar divide).
    return jnp.sum(row_loss) / jnp.sum(msk)


def _reference(log_probs, target, mask):
    B, T, V = log_probs.shape
    tgt = target[:, :T]
    msk = mask[:, :T].astype(jnp.float32)
    gathered = jnp.take_along_axis(log_probs, tgt[:, :, None], axis=2)[..., 0]
    return jnp.sum(-gathered.astype(jnp.float32) * msk) / jnp.sum(msk)


if __name__ == "__main__":
    key = jax.random.PRNGKey(0)

    # --- Test 1: basic shapes, target/mask longer than input T (truncation) ---
    B, T, V, T_full = 2, 16, 128, 20
    k1, k2, k3 = jax.random.split(key, 3)
    logits = jax.random.normal(k1, (B, T, V), dtype=jnp.float32)
    log_probs = jax.nn.log_softmax(logits, axis=-1)
    target = jax.random.randint(k2, (B, T_full), 0, V, dtype=jnp.int32)
    lens = jnp.array([12, 16], dtype=jnp.int32)
    mask = (jnp.arange(T_full)[None, :] < lens[:, None]).astype(jnp.float32)

    res1 = jax.block_until_ready(language_model_criterion(log_probs, target, mask))
    ref1 = _reference(log_probs, target, mask)
    assert jnp.allclose(res1, ref1, rtol=1e-5, atol=1e-6), (res1, ref1)

    # --- Test 2: ragged everything (N not multiple of 16, V > vocab tile,
    #             V not multiple of 128) to exercise the OOB-gating paths ---
    B2, T2, V2 = 3, 7, 2500
    k4, k5, k6 = jax.random.split(k3, 3)
    logits2 = jax.random.normal(k4, (B2, T2, V2), dtype=jnp.float32)
    log_probs2 = jax.nn.log_softmax(logits2, axis=-1)
    target2 = jax.random.randint(k5, (B2, T2 + 3), 0, V2, dtype=jnp.int32)
    mask2 = (jax.random.uniform(k6, (B2, T2 + 3)) > 0.3).astype(jnp.float32)
    mask2 = mask2.at[:, 0].set(1.0)  # ensure non-zero denominator

    res2 = jax.block_until_ready(language_model_criterion(log_probs2, target2, mask2))
    ref2 = _reference(log_probs2, target2, mask2)
    assert jnp.allclose(res2, ref2, rtol=1e-5, atol=1e-6), (res2, ref2)

    # --- Test 3: bf16 inputs (exercises the no-full-tile-upcast path) ---
    log_probs3 = log_probs.astype(jnp.bfloat16)
    res3 = jax.block_until_ready(language_model_criterion(log_probs3, target, mask))
    ref3 = _reference(log_probs3, target, mask)
    assert jnp.allclose(res3, ref3, rtol=1e-4, atol=1e-5), (res3, ref3)

    print("KERNEL_OK")
</pallas_src>

<mosaic_0001>
module attributes {stable_mosaic.version = 11 : i64} {
  func.func @_lm_criterion_kernel(%arg0: i32, %arg1: i32, %arg2: memref<16x128xf32, #tpu.memory_space<vmem>>, %arg3: memref<16x1xi32, #tpu.memory_space<vmem>>, %arg4: memref<16x1xf32, #tpu.memory_space<vmem>>, %arg5: memref<16x1xf32, #tpu.memory_space<vmem>>) attributes {dimension_semantics = [#tpu.dimension_semantics<parallel>, #tpu.dimension_semantics<arbitrary>], iteration_bounds = array<i64: 2, 1>, scalar_prefetch = 0 : i64, scratch_operands = 0 : i64, tpu.core_type = #tpu.core_type<tc>, window_params = [{transform_indices = @transform_0, window_bounds = array<i64: 16, 128>}, {transform_indices = @transform_1, window_bounds = array<i64: 16, 1>}, {transform_indices = @transform_2, window_bounds = array<i64: 16, 1>}, {transform_indices = @transform_3, window_bounds = array<i64: 16, 1>}]} {
    %c0 = arith.constant 0 : index
    %c0_0 = arith.constant 0 : index
    %0 = vector.load %arg2[%c0, %c0_0] : memref<16x128xf32, #tpu.memory_space<vmem>>, vector<16x128xf32>
    %c0_1 = arith.constant 0 : index
    %c0_2 = arith.constant 0 : index
    %1 = vector.load %arg3[%c0_1, %c0_2] : memref<16x1xi32, #tpu.memory_space<vmem>>, vector<16x1xi32>
    %2 = tpu.iota {dimensions = array<i32: 1>} : vector<1x128xi32>
    %c128_i32 = arith.constant 128 : i32
    %3 = arith.muli %arg1, %c128_i32 : i32
    %4 = vector.broadcast %3 : i32 to vector<1x128xi32>
    %5 = arith.addi %2, %4 : vector<1x128xi32>
    %6 = vector.broadcast %5 : vector<1x128xi32> to vector<16x128xi32>
    %7 = vector.broadcast %1 : vector<16x1xi32> to vector<16x128xi32>
    %8 = arith.cmpi eq, %6, %7 : vector<16x128xi32>
    %cst = arith.constant 0.000000e+00 : f32
    %9 = vector.broadcast %cst : f32 to vector<16x128xf32>
    %10 = arith.select %8, %0, %9 : vector<16x128xi1>, vector<16x128xf32>
    %cst_3 = arith.constant dense<0.000000e+00> : vector<16xf32>
    %11 = vector.multi_reduction <add>, %10, %cst_3 [1] : vector<16x128xf32> to vector<16xf32>
    %12 = vector.shape_cast %11 : vector<16xf32> to vector<16x1xf32>
    %c0_i32 = arith.constant 0 : i32
    %13 = arith.cmpi eq, %arg1, %c0_i32 : i32
    %14 = arith.extui %13 : i1 to i32
    %c0_i32_4 = arith.constant 0 : i32
    %15 = arith.cmpi ne, %14, %c0_i32_4 : i32
    scf.if %15 {
      %cst_11 = arith.constant 0.000000e+00 : f32
      %22 = vector.broadcast %cst_11 : f32 to vector<16x1xf32>
      %c0_12 = arith.constant 0 : index
      %c0_13 = arith.constant 0 : index
      %23 = vector.load %arg5[%c0_12, %c0_13] : memref<16x1xf32, #tpu.memory_space<vmem>>, vector<16x1xf32>
      tpu.vector_store %arg5[%c0_12, %c0_13], %22 {strides = array<i32>} : memref<16x1xf32, #tpu.memory_space<vmem>>, vector<16x1xf32>,
    } else {
    }
    %c0_5 = arith.constant 0 : index
    %c0_6 = arith.constant 0 : index
    %16 = vector.load %arg5[%c0_5, %c0_6] : memref<16x1xf32, #tpu.memory_space<vmem>>, vector<16x1xf32>
    %17 = arith.addf %16, %12 : vector<16x1xf32>
    %c0_7 = arith.constant 0 : index
    %c0_8 = arith.constant 0 : index
    %18 = vector.load %arg5[%c0_7, %c0_8] : memref<16x1xf32, #tpu.memory_space<vmem>>, vector<16x1xf32>
    tpu.vector_store %arg5[%c0_7, %c0_8], %17 {strides = array<i32>} : memref<16x1xf32, #tpu.memory_space<vmem>>, vector<16x1xf32>,
    %c0_i32_9 = arith.constant 0 : i32
    %19 = arith.cmpi eq, %arg1, %c0_i32_9 : i32
    %20 = arith.extui %19 : i1 to i32
    %c0_i32_10 = arith.constant 0 : i32
    %21 = arith.cmpi ne, %20, %c0_i32_10 : i32
    scf.if %21 {
      %22 = tpu.iota {dimensions = array<i32: 0>} : vector<16x1xi32>
      %c16_i32 = arith.constant 16 : i32
      %23 = arith.muli %arg0, %c16_i32 : i32
      %24 = vector.broadcast %23 : i32 to vector<16x1xi32>
      %25 = arith.addi %22, %24 : vector<16x1xi32>
      %c32_i32 = arith.constant 32 : i32
      %26 = vector.broadcast %c32_i32 : i32 to vector<16x1xi32>
      %27 = arith.cmpi slt, %25, %26 : vector<16x1xi32>
      %c0_11 = arith.constant 0 : index
      %c0_12 = arith.constant 0 : index
      %28 = vector.load %arg5[%c0_11, %c0_12] : memref<16x1xf32, #tpu.memory_space<vmem>>, vector<16x1xf32>
      %cst_13 = arith.constant 0.000000e+00 : f32
      %29 = vector.broadcast %cst_13 : f32 to vector<16x1xf32>
      %30 = arith.subf %29, %28 : vector<16x1xf32>
      %c0_14 = arith.constant 0 : index
      %c0_15 = arith.constant 0 : index
      %31 = vector.load %arg4[%c0_14, %c0_15] : memref<16x1xf32, #tpu.memory_space<vmem>>, vector<16x1xf32>
      %32 = arith.mulf %30, %31 : vector<16x1xf32>
      %cst_16 = arith.constant 0.000000e+00 : f32
      %33 = vector.broadcast %cst_16 : f32 to vector<16x1xf32>
      %34 = arith.select %27, %32, %33 : vector<16x1xi1>, vector<16x1xf32>
      %c0_17 = arith.constant 0 : index
      %c0_18 = arith.constant 0 : index
      %35 = vector.load %arg5[%c0_17, %c0_18] : memref<16x1xf32, #tpu.memory_space<vmem>>, vector<16x1xf32>
      tpu.vector_store %arg5[%c0_17, %c0_18], %34 {strides = array<i32>} : memref<16x1xf32, #tpu.memory_space<vmem>>, vector<16x1xf32>,
    } else {
    }
    return
  }
  func.func @transform_0(%arg0: i32, %arg1: i32) -> (i32, i32) {
    %c0_i32 = arith.constant 0 : i32
    return %arg0, %arg1 : i32, i32
  }
  func.func @transform_1(%arg0: i32, %arg1: i32) -> (i32, i32) {
    %c0_i32 = arith.constant 0 : i32
    %c0_i32_0 = arith.constant 0 : i32
    return %arg0, %c0_i32 : i32, i32
  }
  func.func @transform_2(%arg0: i32, %arg1: i32) -> (i32, i32) {
    %c0_i32 = arith.constant 0 : i32
    %c0_i32_0 = arith.constant 0 : i32
    return %arg0, %c0_i32 : i32, i32
  }
  func.func @transform_3(%arg0: i32, %arg1: i32) -> (i32, i32) {
    %c0_i32 = arith.constant 0 : i32
    %c0_i32_0 = arith.constant 0 : i32
    return %arg0, %c0_i32 : i32, i32
  }
}

</mosaic_0001>

<bundles_post_ra>
// kernel: tpu_custom_call.1
= control target key start
LH: loop header
LB: loop body
LE: loop exit
PB: predicated region body
PF: predicated region fallthrough
CT: control target
= control target key end

     0   :  { %s483_s12 = smov 0   ;;  %s485_s13 = smov 0   ;;  %s550_s0 = inlined_call_operand.vmem [shape: f32[32,128], index: 0, kind: input, shape index: {}]   ;;  %s551_s1 = inlined_call_operand.vmem [shape: s32[32,1], index: 1, kind: input, shape index: {}]   ;;  %s552_s2 = inlined_call_operand.vmem [shape: f32[32,1], index: 2, kind: input, shape index: {}]   ;;  %s553_s3 = inlined_call_operand.vmem [shape: f32[32,1], index: 3, kind: output, shape index: {}]  }
   0x1   :  { %s487_s14 = smov 0  }
   0x2 LB: > { %s25_s15 = sadd.s32 1, %s455_s13  ;;  %p398_p0 = scmp.ge.s32.totalorder %s459_s14, 1  ;;  %s459_s14 = sphi %s487_s14, %s13_s14   ;;  %s455_s13 = sphi %s485_s13, %s555_s13   ;;  %s451_s12 = sphi %s483_s12, %s554_s12  }
   0x3   : > { %p27_p1 = scmp.ge.s32.totalorder %s25_s15, 2  ;;  %p177_p2 = scmp.lt.s32.totalorder %s459_s14, 3 }
   0x5   : > { %s557_s15 = smov (%p27_p1, %s25_s15), 0  ;;  %p178_p3 = pnand %p398_p0, %p177_p2 }
   0x6   : > { %s399_s16 = sshll.u32 (!%p178_p3), %s451_s12, 1  ;;  %v461_v0 = vmov (!%p178_p3), 0   ;;  %vm268_vm0 = vcmask (!%p178_p3), 7168   ;;  %v462_v3 = vmov (!%p178_p3), 0.0   ;;  %v245_v4 = vlaneseq (!%p178_p3)  ;;  %s407_s27 = sshll.u32 (!%p178_p3), %s451_s12, 4 }
   0x7   : > { %181 = sbr.rel (%p178_p3) target bundleno = 310 (0x136), region = 32  ;;  %436 = vset.pattern.permute.xlu0 (!%p178_p3), %v461_v0  ;;  %p215_p4 = scmp.lt.s32.totalorder (!%p178_p3), %s399_s16, 3  ;;  %v285_v20 = vstv (!%p178_p3), %s407_s27 }
   0x8   : > { %v246_v5 = vand.u32 (!%p178_p3), 127, %v245_v4  ;;  %v282_v16 = vshrl.u32 (!%p178_p3), %v245_v4, 7 }
   0xa   : > { %v283_v19 = vadd.s32 (!%p178_p3), 8, %v282_v16  ;;  %v286_v21 = vadd.s32 (!%p178_p3), %v285_v20, %v282_v16 }
   0xc   : > { %v287_v22 = vadd.s32 (!%p178_p3), %v285_v20, %v283_v19  ;;  %vm288_vm3 = vcmp.lt.s32.totalorder (!%p178_p3), %v286_v21, 32 }
   0xe   : > { %s559_s16 = smov (!%p215_p4, %s399_s16), 3  ;;  %vm289_vm4 = vcmp.lt.s32.totalorder %v287_v22, 32 }
   0xf   : > { %s504_s17 = sshll.u32 %s559_s16, 3 }
  0x10   : > { %s227_s20 = scalar_lea.vmem %s551_s1, %s504_s17  ;;  %s514_s23 = scalar_lea.vmem %s553_s3, %s504_s17 }
  0x11   : > { %v243_v1 = vld [vmem:[%s227_s20] sm:$0xff]  ;;  %v244_v2 = vld [vmem:[%s227_s20 + $0x8] sm:$0xff]  ;;  %269 = vst.msk [vmem:[%s514_s23] sm:$0xff] %vm268_vm0, %v462_v3  ;;  %270 = vst.msk [vmem:[%s514_s23 + $0x8] sm:$0xff] %vm268_vm0, %v462_v3  ;;  %s221_s26 = scalar_lea.vmem %s550_s0, %s504_s17  ;;  %s233_s30 = scalar_lea.vmem %s552_s2, %s504_s17 }
  0x12   : > { %251 = vperm.xlu0 %436, %v243_v1   ;;  %v241_v6 = vld [vmem:[%s221_s26] sm:$0xff]  ;;  %v242_v9 = vld [vmem:[%s221_s26 + $0x8] sm:$0xff] }
  0x13   : > { %v294_v23 = vld [vmem:[%s233_s30] sm:$0xff]  ;;  %v295_v24 = vld [vmem:[%s233_s30 + $0x8] sm:$0xff] }
  0x16   : > { %254 = vperm.xlu0 %436, %v244_v2  }
  0x18   : > { %v271_v12 = vld [vmem:[%s514_s23] sm:$0xff]  ;;  %v272_v14 = vld [vmem:[%s514_s23 + $0x8] sm:$0xff] }
  0x91   : > { %v252_v7 = vpop.permute.xlu0 %251 }
  0x92   : > { %vm256_vm1 = vcmp.eq.s32.totalorder %v246_v5, %v252_v7 }
  0x93   : > { %v258_v8 = vsel %vm256_vm1, %v241_v6, 0.0 }
  0x94   : > { %260 = vadd.xlane.f32.xlu1 %v258_v8 }
  0x95   : > { %v255_v10 = vpop.permute.xlu0 %254 }
  0x96   : > { %vm257_vm2 = vcmp.eq.s32.totalorder %v246_v5, %v255_v10 }
  0x97   : > { %v259_v11 = vsel %vm257_vm2, %v242_v9, 0.0 }
  0x98   : > { %262 = vadd.xlane.f32.xlu1 %v259_v11 }
 0x121   : > { %v261_v13 = vpop.xlane.xlu1 %260 }
 0x122   : > { %v273_v15 = vadd.f32 %v271_v12, %v261_v13 }
 0x124   : > { %276 = vst.msk [vmem:[%s514_s23] sm:$0xff] %vm268_vm0, %v273_v15 }
 0x125   : > { %v263_v17 = vpop.xlane.xlu1 %262 }
 0x126   : > { %v274_v18 = vadd.f32 %v272_v14, %v263_v17 }
 0x128   : > { %277 = vst.msk [vmem:[%s514_s23 + $0x8] sm:$0xff] %vm268_vm0, %v274_v18 }
 0x12b   : > { %v290_v25 = vld [vmem:[%s514_s23] sm:$0xff] }
 0x12c   : > { %v292_v27 = vsub.f32 0.0, %v290_v25 }
 0x12e   : > { %v296_v29 = vmul.f32 %v294_v23, %v292_v27 }
 0x12f   : > { %v291_v26 = vld [vmem:[%s514_s23 + $0x8] sm:$0xff] }
 0x130   : > { %v293_v28 = vsub.f32 0.0, %v291_v26  ;;  %v298_v31 = vsel %vm288_vm3, %v296_v29, 0.0 }
 0x131   : > { %300 = vst.msk [vmem:[%s514_s23] sm:$0xff] %vm268_vm0, %v298_v31 }
 0x132   : > { %v297_v30 = vmul.f32 %v295_v24, %v293_v28 }
 0x134   : > { %v299_v32 = vsel %vm289_vm4, %v297_v30, 0.0 }
 0x135   : > { %301 = vst.msk [vmem:[%s514_s23 + $0x8] sm:$0xff] %vm268_vm0, %v299_v32 }
 0x136 PF: > { %s13_s14 = sadd.s32 1, %s459_s14   ;;  %s554_s12 = smov %s455_s13 }
 0x137   : > { %p10_p5 = scmp.ge.s32.totalorder %s13_s14, 4   ;;  %s555_s13 = smov %s557_s15 }
 0x139   :  { %12 = sbr.rel (!%p10_p5) target bundleno = 2 (0x2), region = 76 }

</bundles_post_ra>
